<compile_context>
chip_gen: v5e
topology: v5e:2x2
jax: 0.10.0
libtpu: 0.0.40
codegen_flags: <defaults>
</compile_context>

<pallas_src>
import jax
import jax.numpy as jnp
from jax import lax
from jax.experimental import pallas as pl
from jax.experimental.pallas import tpu as pltpu


_LANE = 128
_SUBLANE = 8
# Conservative working-set budget: comfortably under v7x's 64 MiB physical
# VMEM, far under v5e/v6e's 128 MiB.
_VMEM_BUDGET_BYTES = 40 * 1024 * 1024


def _round_up(x: int, m: int) -> int:
    return ((x + m - 1) // m) * m


def linear_popart_kernel(task_ref, x_ref, w_ref, params_ref, out_ref):
    x = x_ref[...]                                   # (TB, Fp) f32
    w = w_ref[...]                                   # (T,  Fp) f32 (native layout)
    params = params_ref[...]                         # (3, T)   f32: bias / mu / std
    tid = task_ref[...]                              # (TB, 1)  i32

    bias = params[0:1, :]                            # (1, T)
    mu = params[1:2, :]                              # (1, T)
    std = params[2:3, :]                             # (1, T)

    # MXU matmul contracting F on both operands (no transpose of W needed).
    y_full = lax.dot_general(
        x, w,
        dimension_numbers=(((1,), (1,)), ((), ())),
        preferred_element_type=jnp.float32,
    ) + bias                                         # (TB, T)

    # Per-column affine before the select, so mu/std never need their own gathers.
    unnorm_full = y_full * std + mu                  # (TB, T)

    # Per-row column gather via masked reduction (exact for f32: one hit/row).
    TB, T = y_full.shape
    col = lax.broadcasted_iota(jnp.int32, (TB, T), dimension=1)
    mask = col == tid                                # (TB, T) bool

    norm_sel = jnp.sum(jnp.where(mask, y_full, 0.0), axis=1, keepdims=True)        # (TB, 1)
    unnorm_sel = jnp.sum(jnp.where(mask, unnorm_full, 0.0), axis=1, keepdims=True)  # (TB, 1)

    # Single packed store: col 0 = normalized, col 1 = unnormalized.
    out_ref[...] = jnp.concatenate([norm_sel, unnorm_sel], axis=1)


def _choose_batch_tile(batch: int, f_pad: int, num_tasks: int) -> int:
    """Largest batch tile (multiple of 8, <= 512) whose double-buffered working
    set fits the VMEM budget; capped so moderate batches still get >= 2 grid
    steps (pipelining + v7x's second TensorCore)."""
    itemsize = 4
    # Replicated blocks, double-buffered, with sublane/lane padding.
    fixed = 2 * _round_up(num_tasks, _SUBLANE) * f_pad * itemsize          # weight
    fixed += 2 * _SUBLANE * _round_up(num_tasks, _LANE) * itemsize         # packed params
    # Per batch-row bytes across the double-buffered x / task / out windows
    # (task and out tiles lane-pad to 128).
    per_row = 2 * (f_pad + _LANE + _LANE) * itemsize
    tb = max(_SUBLANE, (_VMEM_BUDGET_BYTES - fixed) // per_row)
    tb = min(512, tb)
    # Keep the grid >= 4 (or >= 2) steps when the batch allows it.
    if batch >= 4 * _SUBLANE:
        tb = min(tb, _round_up(-(-batch // 4), _SUBLANE))
    elif batch >= 2 * _SUBLANE:
        tb = min(tb, _round_up(-(-batch // 2), _SUBLANE))
    tb = max(_SUBLANE, (tb // _SUBLANE) * _SUBLANE)
    # Never pad a small batch up to a huge tile.
    tb = min(tb, _round_up(batch, _SUBLANE))
    return tb


def linear_popart_forward(x, task_id, weight, bias, mu, std):
    """x: [B, F] f32, task_id: [B] int. Returns dict of [B] f32 arrays."""
    B, F = x.shape
    T = weight.shape[0]
    itemsize = 4

    # Lane-dense feature dim and batch padded to a multiple of the tile.
    f_pad = max(_LANE, _round_up(F, _LANE))
    tb = _choose_batch_tile(B, f_pad, T)
    b_pad = _round_up(B, tb)

    x_p = x.astype(jnp.float32)
    if f_pad != F or b_pad != B:
        x_p = jnp.pad(x_p, ((0, b_pad - B), (0, f_pad - F)))
    w_p = weight.astype(jnp.float32)
    if f_pad != F:
        w_p = jnp.pad(w_p, ((0, 0), (0, f_pad - F)))

    task_2d = task_id.astype(jnp.int32).reshape(B, 1)
    if b_pad != B:
        task_2d = jnp.pad(task_2d, ((0, b_pad - B), (0, 0)))  # padded rows -> task 0, sliced off

    # Pack bias / mu / std into one small (3, T) VMEM input.
    params = jnp.stack(
        [bias.reshape(T), mu.reshape(T), std.reshape(T)], axis=0
    ).astype(jnp.float32)

    grid = (b_pad // tb,)

    # Scoped-VMEM limit from the actual double-buffered working set (+ headroom),
    # kept below v7x's 64 MiB physical VMEM.
    vmem_need = (
        2 * tb * f_pad                                   # x window
        + 2 * _round_up(T, _SUBLANE) * f_pad             # weight
        + 2 * _SUBLANE * _round_up(T, _LANE)             # packed params
        + 2 * tb * _LANE                                 # task_id tile (lane-padded)
        + 2 * tb * _LANE                                 # output tile (lane-padded)
    ) * itemsize
    vmem_limit = int(min(max(vmem_need + (8 << 20), 16 << 20), 48 << 20))

    cost = pl.CostEstimate(
        flops=2 * b_pad * f_pad * T,
        transcendentals=0,
        bytes_accessed=(b_pad * f_pad + T * f_pad + 3 * T + b_pad + 2 * b_pad) * itemsize,
    )

    out = pl.pallas_call(
        linear_popart_kernel,
        out_shape=jax.ShapeDtypeStruct((b_pad, 2), jnp.float32),
        grid=grid,
        in_specs=[
            pl.BlockSpec((tb, 1), lambda i: (i, 0)),        # task_id tile
            pl.BlockSpec((tb, f_pad), lambda i: (i, 0)),    # x tile (streamed)
            pl.BlockSpec((T, f_pad), lambda i: (0, 0)),     # W (replicated, native (T,F))
            pl.BlockSpec((3, T), lambda i: (0, 0)),         # packed bias/mu/std (replicated)
        ],
        out_specs=pl.BlockSpec((tb, 2), lambda i: (i, 0)),
        compiler_params=pltpu.CompilerParams(
            dimension_semantics=("parallel",),
            vmem_limit_bytes=vmem_limit,
        ),
        cost_estimate=cost,
    )(task_2d, x_p, w_p, params)

    return {
        'normalized': out[:B, 0],
        'unnormalized': out[:B, 1],
    }


if __name__ == "__main__":
    # Module config (synthetic, deterministic init).
    num_tasks = 4
    in_features = 32
    batch = 8

    key = jax.random.PRNGKey(0)
    k_w, k_b, k_x, k_t = jax.random.split(key, 4)

    # nn.Linear(in_features, num_tasks): weight [num_tasks, in_features], bias [num_tasks]
    bound = 1.0 / (in_features ** 0.5)
    weight = jax.random.uniform(k_w, (num_tasks, in_features),
                                minval=-bound, maxval=bound, dtype=jnp.float32)
    bias = jax.random.uniform(k_b, (num_tasks,),
                              minval=-bound, maxval=bound, dtype=jnp.float32)

    # Popart buffers: mu = 0, nu = 1, std = sqrt(nu - mu^2) = 1
    mu = jnp.zeros((num_tasks,), jnp.float32)
    nu = jnp.ones((num_tasks,), jnp.float32)
    std = jnp.sqrt(nu - mu ** 2)

    # Inputs
    x = jax.random.normal(k_x, (batch, in_features), dtype=jnp.float32)
    task_id = jax.random.randint(k_t, (batch,), 0, num_tasks, dtype=jnp.int32)

    out = linear_popart_forward(x, task_id, weight, bias, mu, std)
    jax.block_until_ready(out)

    # Reference check in plain JAX.
    y_full_ref = x @ weight.T + bias
    y_ref = y_full_ref[jnp.arange(batch), task_id]
    norm_ref = y_ref
    unnorm_ref = y_ref * std[task_id] + mu[task_id]
    assert jnp.allclose(out['normalized'], norm_ref, atol=1e-5, rtol=1e-5)
    assert jnp.allclose(out['unnormalized'], unnorm_ref, atol=1e-5, rtol=1e-5)

    print("KERNEL_OK")
</pallas_src>

<mosaic_0001>
module attributes {stable_mosaic.version = 11 : i64} {
  func.func @linear_popart_kernel(%arg0: i32, %arg1: memref<8x1xi32, #tpu.memory_space<vmem>>, %arg2: memref<8x128xf32, #tpu.memory_space<vmem>>, %arg3: memref<4x128xf32, #tpu.memory_space<vmem>>, %arg4: memref<3x4xf32, #tpu.memory_space<vmem>>, %arg5: memref<8x2xf32, #tpu.memory_space<vmem>>) attributes {dimension_semantics = [#tpu.dimension_semantics<parallel>], iteration_bounds = array<i64: 1>, scalar_prefetch = 0 : i64, scratch_operands = 0 : i64, tpu.core_type = #tpu.core_type<tc>, window_params = [{transform_indices = @transform_0, window_bounds = array<i64: 8, 1>}, {transform_indices = @transform_1, window_bounds = array<i64: 8, 128>}, {pipeline_mode = #tpu.pipeline_mode<synchronous>, transform_indices = @transform_2, window_bounds = array<i64: 4, 128>}, {pipeline_mode = #tpu.pipeline_mode<synchronous>, transform_indices = @transform_3, window_bounds = array<i64: 3, 4>}, {transform_indices = @transform_4, window_bounds = array<i64: 8, 2>}]} {
    %c0 = arith.constant 0 : index
    %c0_0 = arith.constant 0 : index
    %0 = vector.load %arg2[%c0, %c0_0] : memref<8x128xf32, #tpu.memory_space<vmem>>, vector<8x128xf32>
    %c0_1 = arith.constant 0 : index
    %c0_2 = arith.constant 0 : index
    %1 = vector.load %arg3[%c0_1, %c0_2] : memref<4x128xf32, #tpu.memory_space<vmem>>, vector<4x128xf32>
    %c0_3 = arith.constant 0 : index
    %c0_4 = arith.constant 0 : index
    %2 = vector.load %arg4[%c0_3, %c0_4] : memref<3x4xf32, #tpu.memory_space<vmem>>, vector<3x4xf32>
    %c0_5 = arith.constant 0 : index
    %c0_6 = arith.constant 0 : index
    %3 = vector.load %arg1[%c0_5, %c0_6] : memref<8x1xi32, #tpu.memory_space<vmem>>, vector<8x1xi32>
    %4 = vector.extract_strided_slice %2 {offsets = [0, 0], sizes = [1, 4], strides = [1, 1]} : vector<3x4xf32> to vector<1x4xf32>
    %5 = vector.extract_strided_slice %2 {offsets = [1, 0], sizes = [1, 4], strides = [1, 1]} : vector<3x4xf32> to vector<1x4xf32>
    %6 = vector.extract_strided_slice %2 {offsets = [2, 0], sizes = [1, 4], strides = [1, 1]} : vector<3x4xf32> to vector<1x4xf32>
    %cst = arith.constant dense<0.000000e+00> : vector<8x4xf32>
    %7 = tpu.matmul %0, %1, %cst {dimension_numbers = #tpu.dot_dimension_numbers<[1], [1], [0], [0], [0, 0, 1, 0], [], []>} : vector<8x128xf32>, vector<4x128xf32>, vector<8x4xf32> -> vector<8x4xf32>
    %8 = vector.broadcast %4 : vector<1x4xf32> to vector<8x4xf32>
    %9 = arith.addf %7, %8 : vector<8x4xf32>
    %10 = vector.broadcast %6 : vector<1x4xf32> to vector<8x4xf32>
    %11 = arith.mulf %9, %10 : vector<8x4xf32>
    %12 = vector.broadcast %5 : vector<1x4xf32> to vector<8x4xf32>
    %13 = arith.addf %11, %12 : vector<8x4xf32>
    %14 = tpu.iota {dimensions = array<i32: 1>} : vector<8x4xi32>
    %15 = vector.broadcast %3 : vector<8x1xi32> to vector<8x4xi32>
    %16 = arith.cmpi eq, %14, %15 : vector<8x4xi32>
    %cst_7 = arith.constant 0.000000e+00 : f32
    %17 = vector.broadcast %cst_7 : f32 to vector<8x4xf32>
    %18 = arith.select %16, %9, %17 : vector<8x4xi1>, vector<8x4xf32>
    %cst_8 = arith.constant dense<0.000000e+00> : vector<8xf32>
    %19 = vector.multi_reduction <add>, %18, %cst_8 [1] : vector<8x4xf32> to vector<8xf32>
    %20 = vector.shape_cast %19 : vector<8xf32> to vector<8x1xf32>
    %cst_9 = arith.constant 0.000000e+00 : f32
    %21 = vector.broadcast %cst_9 : f32 to vector<8x4xf32>
    %22 = arith.select %16, %13, %21 : vector<8x4xi1>, vector<8x4xf32>
    %cst_10 = arith.constant dense<0.000000e+00> : vector<8xf32>
    %23 = vector.multi_reduction <add>, %22, %cst_10 [1] : vector<8x4xf32> to vector<8xf32>
    %24 = vector.shape_cast %23 : vector<8xf32> to vector<8x1xf32>
    %25 = tpu.concatenate %20, %24 in 1 : vector<8x1xf32>, vector<8x1xf32> -> vector<8x2xf32>
    %c0_11 = arith.constant 0 : index
    %c0_12 = arith.constant 0 : index
    %26 = vector.load %arg5[%c0_11, %c0_12] : memref<8x2xf32, #tpu.memory_space<vmem>>, vector<8x2xf32>
    tpu.vector_store %arg5[%c0_11, %c0_12], %25 {strides = array<i32>} : memref<8x2xf32, #tpu.memory_space<vmem>>, vector<8x2xf32>,
    return
  }
  func.func @transform_0(%arg0: i32) -> (i32, i32) {
    %c0_i32 = arith.constant 0 : i32
    %c0_i32_0 = arith.constant 0 : i32
    return %arg0, %c0_i32 : i32, i32
  }
  func.func @transform_1(%arg0: i32) -> (i32, i32) {
    %c0_i32 = arith.constant 0 : i32
    %c0_i32_0 = arith.constant 0 : i32
    return %arg0, %c0_i32 : i32, i32
  }
  func.func @transform_2(%arg0: i32) -> (i32, i32) {
    %c0_i32 = arith.constant 0 : i32
    %c0_i32_0 = arith.constant 0 : i32
    %c0_i32_1 = arith.constant 0 : i32
    return %c0_i32, %c0_i32_0 : i32, i32
  }
  func.func @transform_3(%arg0: i32) -> (i32, i32) {
    %c0_i32 = arith.constant 0 : i32
    %c0_i32_0 = arith.constant 0 : i32
    %c0_i32_1 = arith.constant 0 : i32
    return %c0_i32, %c0_i32_0 : i32, i32
  }
  func.func @transform_4(%arg0: i32) -> (i32, i32) {
    %c0_i32 = arith.constant 0 : i32
    %c0_i32_0 = arith.constant 0 : i32
    return %arg0, %c0_i32 : i32, i32
  }
}

</mosaic_0001>

<bundles_post_ra>
// kernel: tpu_custom_call.1
= control target key start
LH: loop header
LB: loop body
LE: loop exit
PB: predicated region body
PF: predicated region fallthrough
CT: control target
= control target key end

     0   :  { %9 = vsyncpa [#allocation3], 0  ;;  %s198_s0 = inlined_call_operand.vmem [shape: s32[8,1], index: 0, kind: input, shape index: {}]   ;;  %s199_s1 = inlined_call_operand.vmem [shape: f32[8,128], index: 1, kind: input, shape index: {}]   ;;  %s200_s2 = inlined_call_operand.hbm [shape: f32[4,128], index: 2, kind: input, shape index: {}]   ;;  %s201_s3 = inlined_call_operand.hbm [shape: f32[3,4], index: 3, kind: input, shape index: {}]   ;;  %s202_s4 = inlined_call_operand.vmem [shape: f32[8,2], index: 4, kind: output, shape index: {}]  }
   0x1   :  { %s20_s17 = sshll.u32 %s200_s2, 4  ;;  %s21_s17 = int_to_ptr.hbm [resolvable:$true] %s20_s17 }
   0x2   :  { %10 = vsyncpa [#allocation5], 0  ;;  %s155_s18 = smov [#allocation2]   ;;  %s31_s22 = sshll.u32 %s201_s3, 4  ;;  %s32_s22 = int_to_ptr.hbm [resolvable:$true] %s31_s22 }
   0x3   :  { %s22_s19 = sshll.u32 %s155_s18, 4  ;;  %s156_s23 = smov [#allocation4]   ;;  %s23_s19 = int_to_ptr.vmem [resolvable:$true] %s22_s19 }
   0x4   :  { %25 = dma.hbm_to_vmem [thread:$0]  %s21_s17, 64, %s23_s19, [#allocation3]  }
   0x5   :  { %s33_s24 = sshll.u32 %s156_s23, 4  ;;  %s34_s24 = int_to_ptr.vmem [resolvable:$true] %s33_s24 }
   0x6   :  { %36 = dma.hbm_to_vmem [thread:$0]  %s32_s22, 64, %s34_s24, [#allocation5]  }
   0x7   :  { %151 = dma.done.wait [#allocation3], 64  }
   0x8   :  { %152 = vsyncadd [#allocation3], 4294967232 }
   0x9   :  { %153 = dma.done.wait [#allocation5], 64  }
   0xa   :  { %154 = vsyncadd [#allocation5], 4294967232  ;;  %v157_v0 = vmov 0   ;;  %v46_v1 = vld [vmem:[#allocation2] sm:$0xf]  ;;  %v74_v4 = vlaneseq  ;;  %vm81_vm1 = vcmask 31744  }
   0xb   :  { %102 = vset.pattern.permute.xlu0 %v157_v0  ;;  %v48_v2 = vld [vmem:[%s198_s0] sm:$0xff]  ;;  %65 = vmatpush.xpose.msra.mxu0 %v46_v1  ;;  %vm89_vm2 = vcmask 7168   ;;  %vm91_vm3 = vcmask 15360  }
   0xc   :  { %v45_v3 = vld [vmem:[%s199_s1] sm:$0xff]  ;;  %77 = vperm.xlu0 %102, %v48_v2   ;;  %v75_v6 = vand.u32 127, %v74_v4 }
   0xd   :  { %v47_v5 = vld [vmem:[#allocation4] sm:$0x7] }
   0xe   :  { %66 = vmatmul.f32.vlgmr.msra.gmra.mxu0 %v45_v3  ;;  %v49_v7 = vperm.slane %v47_v5, 0  ;;  %v70_v9 = vperm.slane %v47_v5, 2  ;;  %v72_v12 = vperm.slane %v47_v5, 1 }
  0x7e   :  { %v78_v8 = vpop.permute.xlu0 %77 }
  0x7f   :  { %vm79_vm0 = vcmp.eq.s32.totalorder %v75_v6, %v78_v8 }
  0x8b   :  { %v67_v10 = vpop.f32.mrf.mxu0 }
  0x8c   :  { %v68_v11 = vadd.f32 %v67_v10, %v49_v7 }
  0x8e   :  { %v71_v13 = vmul.f32 %v70_v9, %v68_v11  ;;  %v80_v14 = vsel %vm79_vm0, %v68_v11, 0.0 }
  0x8f   :  { %v82_v15 = vsel %vm81_vm1, %v80_v14, 0.0 }
  0x90   :  { %83 = vadd.xlane.f32.xlu0 %v82_v15  ;;  %v73_v16 = vadd.f32 %v72_v12, %v71_v13 }
  0x92   :  { %v85_v17 = vsel %vm79_vm0, %v73_v16, 0.0 }
  0x93   :  { %v86_v18 = vsel %vm81_vm1, %v85_v17, 0.0 }
  0x94   :  { %87 = vadd.xlane.f32.xlu1 %v86_v18 }
 0x103   :  { %v84_v19 = vpop.xlane.xlu0 %83 }
 0x107   :  { %v88_v20 = vpop.xlane.xlu1 %87 }
 0x108   :  { %v90_v21 = vsel %vm89_vm2, %v84_v19, %v88_v20 }
 0x109   :  { %92 = vst.msk [vmem:[%s202_s4] sm:$0xff] %vm91_vm3, %v90_v21 }
 0x10a   :  { %97 = vsyncpa [#allocation3], 1 }
 0x10b   :  { %98 = vsyncpa [#allocation5], 1 }

</bundles_post_ra>
